<compile_context>
chip_gen: v7x
topology: tpu7x:2x2x1
jax: 0.10.0
libtpu: 0.0.40
codegen_flags: <defaults>
</compile_context>

<pallas_src>
import math
import numpy as np
import jax
import jax.numpy as jnp
from jax.experimental import pallas as pl
from jax.experimental.pallas import tpu as pltpu


# ---------------------------------------------------------------------------
# deterministic parameter construction (mirrors GaussianBlur2d.__init__ and
# PyTorch's upsample_bicubic2d coefficients)
# ---------------------------------------------------------------------------
def _gaussian_1d(sigma: float, z_score_cutoff: int = 3) -> np.ndarray:
    """Normalized 1-D Gaussian taps; outer(g, g) equals the module's 2-D kernel."""
    ks = 2 * z_score_cutoff * sigma + 1          # float, like the torch code
    if ks % 2 == 0:
        ks += 1
    lo = -ks // 2 + 1
    hi = ks // 2 + 1
    c = np.arange(lo, hi, dtype=np.float64)
    g = np.exp(-(c ** 2) / (2.0 * sigma ** 2))
    g /= g.sum()
    return g


def _gaussian_kernel_2d(sigma: float, z_score_cutoff: int = 3) -> np.ndarray:
    """Exact 2-D kernel, used only by the pure-JAX reference."""
    ks = 2 * z_score_cutoff * sigma + 1
    if ks % 2 == 0:
        ks += 1
    lo = -ks // 2 + 1
    hi = ks // 2 + 1
    c = np.arange(lo, hi, dtype=np.float32)
    xx, yy = np.meshgrid(c, c, indexing="ij")
    k = np.exp(-(xx ** 2 + yy ** 2) / (2.0 * sigma ** 2))
    k /= k.sum()
    return k.astype(np.float32)


def _bicubic_matrix(in_size: int, out_size: int, A: float = -0.75) -> np.ndarray:
    """(out_size, in_size) matrix reproducing torch bicubic, align_corners=False."""
    def c1(x):  # |x| <= 1
        return ((A + 2.0) * x - (A + 3.0)) * x * x + 1.0

    def c2(x):  # 1 < |x| < 2
        return ((A * x - 5.0 * A) * x + 8.0 * A) * x - 4.0 * A

    scale = in_size / out_size
    M = np.zeros((out_size, in_size), np.float64)
    for i in range(out_size):
        src = scale * (i + 0.5) - 0.5
        f = math.floor(src)
        t = src - f
        ws = (c2(t + 1.0), c1(t), c1(1.0 - t), c2(2.0 - t))
        for k, w in enumerate(ws):
            idx = min(max(f - 1 + k, 0), in_size - 1)   # border clamp
            M[i, idx] += w
    return M


def _conv_matrix(g: np.ndarray, in_size: int, crop: int) -> np.ndarray:
    """(crop, in_size) banded matrix: 'valid' 1-D correlation with taps g,
    keeping only the first `crop` output rows (the module's parity crop)."""
    K = g.shape[0]
    M = np.zeros((crop, in_size), np.float64)
    for r in range(crop):
        M[r, r:r + K] = g
    return M


def _geometry(H, W, K, downscale):
    pad_l = pad_t = K // 2
    pad_r = pad_l + int(W % 2 == 0)
    pad_b = pad_t + int(H % 2 == 0)
    Hc = H + pad_t + pad_b - K + 1               # conv2d "valid" output size
    Wc = W + pad_l + pad_r - K + 1
    Hcrop = Hc - (2 if Hc % 2 == 0 else 1)       # x[:, :, :-2 or -1, :-2 or -1]
    Wcrop = Wc - (2 if Wc % 2 == 0 else 1)
    Hout = int(H * downscale)
    Wout = int(W * downscale)
    return pad_l, pad_r, pad_t, pad_b, Hcrop, Wcrop, Hout, Wout


# ---------------------------------------------------------------------------
# Pallas implementation
# ---------------------------------------------------------------------------
def blur_and_downsample(x: jax.Array, scale_factor: float = 2.0,
                        block_n: int = 8) -> jax.Array:
    B, C, H, W = x.shape
    assert C == 1, "reference module's (1,1,K,K) conv weight requires C == 1"
    assert block_n % 8 == 0, "block_n must be a multiple of 8 (sublane tiling)"
    downscale = 1.0 / scale_factor
    sigma = 2.0 * scale_factor / 6.0

    g1 = _gaussian_1d(sigma)                     # (K,) float64
    K = g1.shape[0]
    pad_l, pad_r, pad_t, pad_b, Hcrop, Wcrop, Hout, Wout = _geometry(H, W, K, downscale)
    Hp, Wp = H + pad_t + pad_b, W + pad_l + pad_r

    # Fold blur + parity-crop + bicubic resample into two small matrices.
    ahp = _bicubic_matrix(Hcrop, Hout) @ _conv_matrix(g1, Hp, Hcrop)   # (Hout, Hp)
    awp = _bicubic_matrix(Wcrop, Wout) @ _conv_matrix(g1, Wp, Wcrop)   # (Wout, Wp)

    N = B * C
    NB = block_n
    n_blocks = -(-N // NB)
    N_pad = n_blocks * NB

    # Block-diagonal replication of Ah': one 2-D matmul performs the whole
    # NB-image column pass and produces the stacked per-image outputs.
    ah_blk = np.kron(np.eye(NB, dtype=np.float64), ahp).astype(np.float32)  # (NB*Hout, NB*Hp)
    awp_t = np.ascontiguousarray(awp.T).astype(np.float32)                  # (Wp, Wout)

    xf = x.reshape(N, H, W).astype(jnp.float32)
    xpad = jnp.pad(xf, ((0, 0), (pad_t, pad_b), (pad_l, pad_r)), mode="reflect")
    if N_pad != N:
        xpad = jnp.pad(xpad, ((0, N_pad - N), (0, 0), (0, 0)))
    x_flat = xpad.reshape(N_pad * Hp, Wp)        # row-flattened: lane dim = Wp

    def kernel(x_ref, ah_ref, awt_ref, o_ref):
        # row (W) pass: one MXU matmul over all NB*Hp rows of this block
        t = jnp.dot(x_ref[...], awt_ref[...], preferred_element_type=jnp.float32)
        # column (H) pass: block-diagonal Ah' -> stacked per-image outputs
        o_ref[...] = jnp.dot(ah_ref[...], t,
                             preferred_element_type=jnp.float32).astype(o_ref.dtype)

    flops = 2 * N_pad * (Hp * Wp * Wout + Hout * Hp * Wout)
    bytes_accessed = 4 * (N_pad * Hp * Wp + N_pad * Hout * Wout
                          + int(ah_blk.size) + int(awp_t.size))

    out_flat = pl.pallas_call(
        kernel,
        out_shape=jax.ShapeDtypeStruct((N_pad * Hout, Wout), jnp.float32),
        grid_spec=pltpu.PrefetchScalarGridSpec(
            num_scalar_prefetch=0,
            grid=(n_blocks,),
            in_specs=[
                pl.BlockSpec((NB * Hp, Wp), lambda g: (g, 0)),
                pl.BlockSpec((NB * Hout, NB * Hp), lambda g: (0, 0)),
                pl.BlockSpec((Wp, Wout), lambda g: (0, 0)),
            ],
            out_specs=pl.BlockSpec((NB * Hout, Wout), lambda g: (g, 0)),
        ),
        compiler_params=pltpu.CompilerParams(
            dimension_semantics=("parallel",),           # batch blocks are independent
            vmem_limit_bytes=64 * 1024 * 1024,           # headroom for larger NB / images
        ),
        cost_estimate=pl.CostEstimate(
            flops=flops, transcendentals=0, bytes_accessed=bytes_accessed),
    )(x_flat, jnp.asarray(ah_blk), jnp.asarray(awp_t))

    # TODO(synk): output lane width is Wout (< 128 for small images); a fully
    # lane-dense output slab would need an in-kernel retiling not worth it here.
    out = out_flat[: N * Hout].reshape(N, Hout, Wout)
    return out.reshape(B, C, Hout, Wout)


# ---------------------------------------------------------------------------
# pure-JAX reference (explicit 25-tap blur + bicubic matrices) for sanity check
# ---------------------------------------------------------------------------
def blur_and_downsample_ref(x: jax.Array, scale_factor: float = 2.0) -> jax.Array:
    B, C, H, W = x.shape
    downscale = 1.0 / scale_factor
    sigma = 2.0 * scale_factor / 6.0
    gk = _gaussian_kernel_2d(sigma)
    K = gk.shape[0]
    pad_l, pad_r, pad_t, pad_b, Hcrop, Wcrop, Hout, Wout = _geometry(H, W, K, downscale)
    ah = jnp.asarray(_bicubic_matrix(Hcrop, Hout), jnp.float32)
    aw = jnp.asarray(_bicubic_matrix(Wcrop, Wout), jnp.float32)

    xf = x.reshape(B * C, H, W).astype(jnp.float32)
    xpad = jnp.pad(xf, ((0, 0), (pad_t, pad_b), (pad_l, pad_r)), mode="reflect")
    blur = jnp.zeros((B * C, Hcrop, Wcrop), jnp.float32)
    for dy in range(K):
        for dx in range(K):
            blur = blur + float(gk[dy, dx]) * xpad[:, dy:dy + Hcrop, dx:dx + Wcrop]
    out = jnp.einsum("oh,nhw,pw->nop", ah, blur, aw)
    return out.reshape(B, C, Hout, Wout)


if __name__ == "__main__":
    key = jax.random.PRNGKey(0)
    x = jax.random.normal(key, (16, 1, 16, 16), dtype=jnp.float32)

    y = blur_and_downsample(x, scale_factor=2.0)
    y = jax.block_until_ready(y)

    y_ref = jax.block_until_ready(blur_and_downsample_ref(x, scale_factor=2.0))

    assert y.shape == (16, 1, 8, 8), y.shape
    assert y.dtype == jnp.float32, y.dtype
    np.testing.assert_allclose(np.asarray(y), np.asarray(y_ref), rtol=1e-4, atol=2e-5)

    print("KERNEL_OK")
</pallas_src>

<mosaic_0001>
module attributes {stable_mosaic.version = 11 : i64} {
  func.func @kernel(%arg0: i32, %arg1: memref<168x21xf32, #tpu.memory_space<vmem>>, %arg2: memref<64x168xf32, #tpu.memory_space<vmem>>, %arg3: memref<21x8xf32, #tpu.memory_space<vmem>>, %arg4: memref<64x8xf32, #tpu.memory_space<vmem>>) attributes {dimension_semantics = [#tpu.dimension_semantics<parallel>], iteration_bounds = array<i64: 2>, scalar_prefetch = 0 : i64, scratch_operands = 0 : i64, tpu.core_type = #tpu.core_type<tc>, window_params = [{transform_indices = @transform_0, window_bounds = array<i64: 168, 21>}, {pipeline_mode = #tpu.pipeline_mode<synchronous>, transform_indices = @transform_1, window_bounds = array<i64: 64, 168>}, {pipeline_mode = #tpu.pipeline_mode<synchronous>, transform_indices = @transform_2, window_bounds = array<i64: 21, 8>}, {transform_indices = @transform_3, window_bounds = array<i64: 64, 8>}]} {
    %c0 = arith.constant 0 : index
    %c0_0 = arith.constant 0 : index
    %0 = vector.load %arg1[%c0, %c0_0] : memref<168x21xf32, #tpu.memory_space<vmem>>, vector<168x21xf32>
    %c0_1 = arith.constant 0 : index
    %c0_2 = arith.constant 0 : index
    %1 = vector.load %arg3[%c0_1, %c0_2] : memref<21x8xf32, #tpu.memory_space<vmem>>, vector<21x8xf32>
    %cst = arith.constant dense<0.000000e+00> : vector<168x8xf32>
    %2 = tpu.matmul %0, %1, %cst {dimension_numbers = #tpu.dot_dimension_numbers<[1], [0], [0], [1], [0, 0, 1, 1], [], []>} : vector<168x21xf32>, vector<21x8xf32>, vector<168x8xf32> -> vector<168x8xf32>
    %c0_3 = arith.constant 0 : index
    %c0_4 = arith.constant 0 : index
    %3 = vector.load %arg2[%c0_3, %c0_4] : memref<64x168xf32, #tpu.memory_space<vmem>>, vector<64x168xf32>
    %cst_5 = arith.constant dense<0.000000e+00> : vector<64x8xf32>
    %4 = tpu.matmul %3, %2, %cst_5 {dimension_numbers = #tpu.dot_dimension_numbers<[1], [0], [0], [1], [0, 0, 1, 1], [], []>} : vector<64x168xf32>, vector<168x8xf32>, vector<64x8xf32> -> vector<64x8xf32>
    %c0_6 = arith.constant 0 : index
    %c0_7 = arith.constant 0 : index
    %5 = vector.load %arg4[%c0_6, %c0_7] : memref<64x8xf32, #tpu.memory_space<vmem>>, vector<64x8xf32>
    tpu.vector_store %arg4[%c0_6, %c0_7], %4 {strides = array<i32>} : memref<64x8xf32, #tpu.memory_space<vmem>>, vector<64x8xf32>,
    return
  }
  func.func @transform_0(%arg0: i32) -> (i32, i32) {
    %c0_i32 = arith.constant 0 : i32
    %c0_i32_0 = arith.constant 0 : i32
    return %arg0, %c0_i32 : i32, i32
  }
  func.func @transform_1(%arg0: i32) -> (i32, i32) {
    %c0_i32 = arith.constant 0 : i32
    %c0_i32_0 = arith.constant 0 : i32
    %c0_i32_1 = arith.constant 0 : i32
    return %c0_i32, %c0_i32_0 : i32, i32
  }
  func.func @transform_2(%arg0: i32) -> (i32, i32) {
    %c0_i32 = arith.constant 0 : i32
    %c0_i32_0 = arith.constant 0 : i32
    %c0_i32_1 = arith.constant 0 : i32
    return %c0_i32, %c0_i32_0 : i32, i32
  }
  func.func @transform_3(%arg0: i32) -> (i32, i32) {
    %c0_i32 = arith.constant 0 : i32
    %c0_i32_0 = arith.constant 0 : i32
    return %arg0, %c0_i32 : i32, i32
  }
}

</mosaic_0001>

<bundles_post_ra>
// kernel: tpu_custom_call.1
= control target key start
LH: loop header
LB: loop body
LE: loop exit
PB: predicated region body
PF: predicated region fallthrough
CT: control target
= control target key end

     0   :  { %8 = vsyncpa [#allocation3], 0  ;;  %s1541_s0 = inlined_call_operand.hbm [shape: f32[336,21], index: 0, kind: input, shape index: {}]   ;;  %s1542_s1 = inlined_call_operand.hbm [shape: f32[64,168], index: 1, kind: input, shape index: {}]   ;;  %s1543_s2 = inlined_call_operand.hbm [shape: f32[21,8], index: 2, kind: input, shape index: {}]   ;;  %s1544_s3 = inlined_call_operand.hbm [shape: f32[128,8], index: 3, kind: output, shape index: {}]  }
   0x1   :  { %10 = vsyncpa [#allocation3 + $0x1], 0 }
   0x2   :  { %11 = vsyncpa [#allocation6], 0 }
   0x3   :  { %12 = vsyncpa [#allocation4], 0 }
   0x4   :  { %14 = vsyncpa [#allocation4 + $0x1], 0  ;;  %s1185_s12 = smov 0   ;;  %s1187_s13 = smov 0  }
   0x5   :  { %s1189_s14 = smov 0   ;;  %s1191_s15 = smov 0  }
   0x6 LB: > { %s1206_s16 = sadd.s32 4294967295, %s1150_s15   ;;  %s743_s17 = sadd.s32 4294967294, %s1150_s15   ;;  %s1150_s15 = sphi %s1191_s15, %s1564_s15   ;;  %s1146_s14 = sphi %s1189_s14, %s1563_s14   ;;  %s1142_s13 = sphi %s1187_s13, %s1562_s13   ;;  %s1138_s12 = sphi %s1185_s12, %s1561_s12  }
   0x7   : > { %p40_p0 = scmp.ne.s32.totalorder %s1142_s13, %s1138_s12  ;;  %p1545_p1 = scmp.eq.s32.totalorder %s1206_s16, 0 }
   0x8   : > { %p112_p3 = scmp.eq.s32.totalorder %s743_s17, 1  ;;  %p744_p5 = scmp.ge.s32.totalorder %s1150_s15, 1 }
   0x9   : > { %p1215_p4 = por %p1545_p1, %p40_p0  ;;  %p119_p7 = scmp.lt.s32.totalorder %s1150_s15, 3 }
   0xa   : > { %p1220_p6 = por %p112_p3, %p40_p0  ;;  %s1152_s21 = smov [#allocation5]  }
   0xb   : > { %s1548_s18 = scalar_select %p1215_p4, 1, 0 }
   0xc   : > { %s1549_s19 = scalar_select %p1220_p6, 1, 0 }
   0xd   : > { %p1225_p8 = pnand %p744_p5, %p119_p7  ;;  %s131_s22 = sshll.u32 %s1152_s21, 4  ;;  %s1229_s22 = int_to_ptr.vmem [resolvable:$true] %s131_s22 }
   0xe   : > { %s1153_s24 = smov [#allocation7]   ;;  %s994_s28 = scalar_lea.hbm %s1542_s1, 2048 }
   0xf   : > { %p930_p9 = pneg %p1225_p8  ;;  %s144_s25 = sshll.u32 %s1153_s24, 4  ;;  %s1240_s25 = int_to_ptr.vmem [resolvable:$true] %s144_s25 }
  0x10   : > { %p995_p12 = scmp.ne.s32.totalorder %s1542_s1, %s994_s28  ;;  %p1001_p5 = scmp.lt.u32.totalorder %s994_s28, %s1542_s1 }
  0x11   : > { %p1236_p11 = pnand %p930_p9, %p1545_p1 }
  0x13   : > { %p996_p13 = pneg %p1236_p11 }
  0x15   : > { %p997_p0 = pnand %p996_p13, %p995_p12 }
  0x17   : > { %p998_p3 = pneg %p997_p0 }
  0x19   : > { %p1003_p7 = pnand %p1001_p5, %p998_p3 }
  0x1b   : > { %1006 = shalt.err (!%p1003_p7)
}
  0x1c   : > { %s1007_s6 = scalar_lea.vmem %s1229_s22, 2048  ;;  %p1015_p2 = scmp.lt.s32.totalorder %s1229_s22, %s1229_s22 }
  0x1d   : > { %p1008_p9 = scmp.ne.s32.totalorder %s1229_s22, %s1007_s6  ;;  %p1016_p12 = scmp.lt.s32.totalorder %s1007_s6, %s1007_s6 }
  0x1f   : > { %p1010_p10 = pnand %p1008_p9, %p996_p13  ;;  %p1017_p0 = por %p1016_p12, %p1015_p2 }
  0x21   : > { %p1011_p1 = pneg %p1010_p10 }
  0x23   : > { %p1018_p6 = pnand %p1017_p0, %p1011_p1 }
  0x25   : > { %1021 = shalt.err (!%p1018_p6)
}
  0x26   : > { %s1154_s7 = smov 256   ;;  %s1155_s8 = smov 16  }
  0x27   : > { %933 = dma.hbm_to_vmem [thread:$0]  (!%p1236_p11), %s1542_s1, 2048, %s1229_s22, [#allocation6], %s1154_s7, %s1154_s7, %s1155_s8  }
  0x28   : > { %s1022_s21 = scalar_lea.hbm %s1543_s2, 384 }
  0x29   : > { %p1023_p2 = scmp.ne.s32.totalorder %s1543_s2, %s1022_s21  ;;  %p1029_p10 = scmp.lt.u32.totalorder %s1022_s21, %s1543_s2 }
  0x2b   : > { %p1025_p1 = pnand %p1023_p2, %p996_p13 }
  0x2d   : > { %p1026_p6 = pneg %p1025_p1 }
  0x2f   : > { %p1031_p3 = pnand %p1029_p10, %p1026_p6 }
  0x31   : > { %1034 = shalt.err (!%p1031_p3)
}
  0x32   : > { %s1035_s22 = scalar_lea.vmem %s1240_s25, 384  ;;  %p1043_p12 = scmp.lt.s32.totalorder %s1240_s25, %s1240_s25 }
  0x33   : > { %p1036_p5 = scmp.ne.s32.totalorder %s1240_s25, %s1035_s22  ;;  %p1044_p0 = scmp.lt.s32.totalorder %s1035_s22, %s1035_s22 }
  0x35   : > { %p1038_p7 = pnand %p1036_p5, %p996_p13  ;;  %p1045_p2 = por %p1044_p0, %p1043_p12 }
  0x37   : > { %p1039_p9 = pneg %p1038_p7 }
  0x39   : > { %p1046_p1 = pnand %p1045_p2, %p1039_p9 }
  0x3b   : > { %1049 = shalt.err (!%p1046_p1)
}
  0x3c   : > { %s1156_s29 = smov 128   ;;  %s1157_s30 = smov 8  }
  0x3d   : > { %936 = dma.hbm_to_vmem [thread:$0]  (!%p1236_p11), %s1543_s2, 384, %s1240_s25, [#allocation6], %s1156_s29, %s1156_s29, %s1157_s30  }
  0x3e   : > { %s1298_s6 = sadd.s32 1, %s1150_s15   ;;  %s27_s8 = sadd.s32 1, %s1146_s14 }
  0x3f   : > { %s24_s7 = ssub.s32 %s1150_s15, %s1298_s6  ;;  %p34_p6 = scmp.ne.s32.totalorder %s1146_s14, %s1142_s13 }
  0x40   : > { %p25_p13 = scmp.eq.s32.totalorder %s24_s7, 0  ;;  %p35_p10 = scmp.eq.s32.totalorder %s1150_s15, 0 }
  0x41   : > { %p1552_p5 = scmp.eq.s32.totalorder %s1206_s16, 1  ;;  %p947_p9 = scmp.lt.s32.totalorder %s1150_s15, 2 }
  0x42   : > { %s1307_s9 = scalar_select %p25_p13, %s1146_s14, %s27_s8  }
  0x43   : > { %p36_p3 = por %p35_p10, %p34_p6  ;;  %p1311_p7 = por %p1552_p5, %p34_p6 }
  0x44   : > { %s158_s10 = sand.u32 1, %s1146_s14   ;;  %s788_s25 = smul.u32 2688, %s1150_s15 }
  0x45   : > { %s1553_s23 = scalar_select %p1311_p7, 1, 0 }
  0x46   : > { %s916_s11 = smul.u32 168, %s158_s10  ;;  %p1318_p11 = pnand %p947_p9, %p36_p3 }
  0x47   : > { %s1325_s26 = scalar_lea.hbm %s1541_s0, %s788_s25  ;;  %s1329_s22 = scalar_lea.sflag [#allocation3], %s158_s10 }
  0x48   : > { %s162_s27 = scalar_lea.vmem [#allocation2], %s916_s11  ;;  %s1050_s4 = scalar_lea.hbm %s1325_s26, 2688 }
  0x49   : > { %s169_s28 = sshll.u32 %s162_s27, 4  ;;  %p1051_p12 = scmp.ne.s32.totalorder %s1325_s26, %s1050_s4  ;;  %s1327_s28 = int_to_ptr.vmem [resolvable:$true] %s169_s28 }
  0x4a   : > { %p1052_p0 = pneg %p1318_p11  ;;  %s1055_s8 = scalar_lea.hbm %s1541_s0, 5376 }
  0x4b   : > { %p1056_p13 = scmp.lt.u32.totalorder %s1325_s26, %s1541_s0  ;;  %p1057_p6 = scmp.lt.u32.totalorder %s1055_s8, %s1050_s4 }
  0x4c   : > { %p1053_p2 = pnand %p1052_p0, %p1051_p12  ;;  %p1059_p3 = scmp.lt.u32.totalorder %s1050_s4, %s1325_s26 }
  0x4d   : > { %p1058_p10 = por %p1057_p6, %p1056_p13 }
  0x4e   : > { %p1054_p1 = pneg %p1053_p2 }
  0x4f   : > { %p1060_p5 = por %p1059_p3, %p1058_p10 }
  0x51   : > { %p1061_p9 = pnand %p1060_p5, %p1054_p1 }
  0x53   : > { %1064 = shalt.err (!%p1061_p9)
}
  0x54   : > { %s1065_s10 = scalar_lea.vmem %s1327_s28, 2688  ;;  %s1158_s11 = smov [#allocation2]  }
  0x55   : > { %p1066_p12 = scmp.ne.s32.totalorder %s1327_s28, %s1065_s10  ;;  %s1070_s24 = sshll.u32 %s1158_s11, 4  ;;  %s1071_s24 = int_to_ptr.vmem [resolvable:$false] %s1070_s24 }
  0x56   : > { %s1072_s27 = scalar_lea.vmem %s1071_s24, 5376  ;;  %p1073_p4 = scmp.lt.s32.totalorder %s1327_s28, %s1071_s24 }
  0x57   : > { %p1068_p2 = pnand %p1066_p12, %p1052_p0  ;;  %p1074_p13 = scmp.lt.s32.totalorder %s1072_s27, %s1065_s10 }
  0x59   : > { %p1069_p7 = pneg %p1068_p2  ;;  %p1075_p6 = por %p1074_p13, %p1073_p4 }
  0x5b   : > { %p1076_p10 = pnand %p1075_p6, %p1069_p7 }
  0x5d   : > { %1079 = shalt.err (!%p1076_p10)
}
  0x5e   : > { %940 = dma.hbm_to_vmem [thread:$0]  (!%p1318_p11), %s1325_s26, 2688, %s1327_s28, %s1329_s22, %s1156_s29, %s1156_s29, %s1157_s30  }
  0x5f   : > { %181 = sbr.rel (%p1225_p8) target bundleno = 664 (0x298), region = 32  ;;  %s1363_s4 = sand.u32 (!%p1225_p8), 1, %s1142_s13  }
  0x60   : > { %s917_s5 = smul.u32 (!%p1225_p8), 168, %s1363_s4  ;;  %s184_s7 = scalar_lea.sflag (!%p1225_p8), [#allocation3], %s1363_s4 }
  0x61   : > { %p1555_p4 = scmp.ne.s32.totalorder (!%p1225_p8), %s1548_s18, 0 }
  0x62   : > { %s1367_s8 = scalar_lea.vmem (!%p1225_p8), [#allocation2], %s917_s5 }
  0x66   : > { %1125 = dma.done.wait (%p1555_p4), %s184_s7, 2688  }
  0x67   : > { %1127 = vsyncadd (%p1555_p4), %s184_s7, 4294964608  ;;  %p1556_p7 = scmp.eq.s32.totalorder %s1206_s16, 0 }
  0x69   : > { %1129 = dma.done.wait (%p1556_p7), [#allocation6], 2432   ;;  %p1557_p8 = pmov %p1556_p7 }
  0x6a   : > { %v1159_v0 = vmov 0.0|0.0   ;;  %vm1160_vm0 = vmmov 0   ;;  %v1161_v1 = vmov 0.0   ;;  %v241_v2 = vld [vmem:[#allocation7] sm:$0xff]  ;;  %v242_v3 = vld [vmem:[#allocation7 + $0x8] sm:$0xff]  ;;  %vm308_vm1 = vcmask 1044480  }
  0x6b   : > { %1131 = vsyncadd (%p1557_p8), [#allocation6], 4294964864  ;;  %883 = vmatprep.subr.bf16.mxu0 %v1159_v0  ;;  %820 = vmatprep.mubr.msk.f32.mxu0 %vm1160_vm0, %v1161_v1  ;;  %v884_v4 = vpack.c.bf16 %v242_v3, %v241_v2  ;;  %v243_v5 = vld [vmem:[#allocation7 + $0x10] sm:$0x1f]  ;;  %vm244_vm2 = vcmask 171008   ;;  %v221_v7 = vld [vmem:[%s1367_s8 + $0x8] sm:$0xff] }
  0x6c   : > { %886 = vmatprep.subr.bf16.mxu1 %v1159_v0  ;;  %v220_v6 = vld [vmem:[%s1367_s8] sm:$0xff]  ;;  %v222_v8 = vld [vmem:[%s1367_s8 + $0x10] sm:$0xff]  ;;  %v223_v9 = vld [vmem:[%s1367_s8 + $0x18] sm:$0xff]  ;;  %vm498_vm3 = vcmask 326656   ;;  %s752_s18 = sshll.u32 %s1363_s4, 6  ;;  %vm628_vm4 = vcmask 64512  }
  0x6d   : > { %885 = vmatpush3.bf16.msra.mxu0 %v884_v4  ;;  %v224_v10 = vld [vmem:[%s1367_s8 + $0x20] sm:$0xff]  ;;  %v225_v11 = vld [vmem:[%s1367_s8 + $0x28] sm:$0xff]  ;;  %v226_v12 = vld [vmem:[%s1367_s8 + $0x30] sm:$0xff]  ;;  %s217_s20 = scalar_lea.vmem [#allocation8], %s752_s18  ;;  %s789_s30 = sshll.u32 %s1206_s16, 10 }
  0x6e   : > { %818 = vmatprep.subr.mxu0 %v1161_v1  ;;  %v227_v13 = vld [vmem:[%s1367_s8 + $0x38] sm:$0xff]  ;;  %v228_v14 = vld [vmem:[%s1367_s8 + $0x40] sm:$0xff]  ;;  %v229_v15 = vld [vmem:[%s1367_s8 + $0x48] sm:$0xff]  ;;  %s651_s29 = sshll.u32 %s217_s20, 4  ;;  %s1496_s28 = scalar_lea.hbm %s1544_s3, %s789_s30  ;;  %s1490_s29 = int_to_ptr.vmem [resolvable:$true] %s651_s29 }
  0x6f   : > { %v230_v16 = vld [vmem:[%s1367_s8 + $0x50] sm:$0xff]  ;;  %v231_v17 = vld [vmem:[%s1367_s8 + $0x58] sm:$0xff]  ;;  %v232_v18 = vld [vmem:[%s1367_s8 + $0x60] sm:$0xff]  ;;  %s638_s22 = scalar_lea.sflag [#allocation4], %s1363_s4  ;;  %s1080_s16 = scalar_lea.vmem %s1490_s29, 1024 }
  0x70   : > { %v233_v19 = vld [vmem:[%s1367_s8 + $0x68] sm:$0xff]  ;;  %v234_v20 = vld [vmem:[%s1367_s8 + $0x70] sm:$0xff]  ;;  %v235_v21 = vld [vmem:[%s1367_s8 + $0x78] sm:$0xff]  ;;  %p1081_p11 = scmp.ne.s32.totalorder %s1490_s29, %s1080_s16  ;;  %p1558_p0 = scmp.ne.s32.totalorder %s1553_s23, 0 }
  0x71   : > { %819 = vmatpush3.msk.msra.mxu0 %vm308_vm1, %v243_v5  ;;  %v236_v22 = vld [vmem:[%s1367_s8 + $0x80] sm:$0xff]  ;;  %v237_v23 = vld [vmem:[%s1367_s8 + $0x88] sm:$0xff]  ;;  %v238_v24 = vld [vmem:[%s1367_s8 + $0x90] sm:$0xff]  ;;  %s1162_s25 = smov [#allocation8]  }
  0x72   : > { %821 = vmatmul.mubr.msk.f32.vlgmr.msra.gmra.mrb[0].mxu0 %vm244_vm2, %v220_v6  ;;  %v239_v25 = vld [vmem:[%s1367_s8 + $0x98] sm:$0xff]  ;;  %v240_v26 = vld [vmem:[%s1367_s8 + $0xa0] sm:$0xff]  ;;  %p1082_p1 = pnand %p1081_p11, %p1558_p0  ;;  %s1084_s21 = sshll.u32 %s1162_s25, 4  ;;  %s1085_s21 = int_to_ptr.vmem [resolvable:$false] %s1084_s21 }
  0x73   : > { %823 = vmatprep.mubr.msk.f32.mxu0 %vm1160_vm0, %v1161_v1  ;;  %v483_v27 = vld [vmem:[#allocation5 + $0x8] sm:$0xff]  ;;  %s1086_s10 = scalar_lea.vmem %s1085_s21, 2048  ;;  %p1087_p5 = scmp.lt.s32.totalorder %s1490_s29, %s1085_s21 }
  0x74   : > { %775 = vmatprep.mubr.msk.f32.mxu1 %vm498_vm3, %v483_v27  ;;  %v495_v27 = vld [vmem:[#allocation5 + $0x68] sm:$0xff]  ;;  %p1083_p3 = pneg %p1082_p1  ;;  %p1088_p9 = scmp.lt.s32.totalorder %s1086_s10, %s1080_s16 }
  0x76   : > { %824 = vmatmul.mubr.msk.f32.gmra.mrb[2].mxu0 %vm244_vm2, %v221_v7  ;;  %p1089_p12 = por %p1088_p9, %p1087_p5 }
  0x77   : > { %826 = vmatprep.mubr.msk.f32.mxu0 %vm1160_vm0, %v1161_v1 }
  0x78   : > { %p1090_p2 = pnand %p1089_p12, %p1083_p3 }
  0x7a   : > { %827 = vmatmul.mubr.msk.f32.gmra.mrb[4].mxu0 %vm244_vm2, %v222_v8 }
  0x7b   : > { %829 = vmatprep.mubr.msk.f32.mxu0 %vm1160_vm0, %v1161_v1 }
  0x7e   : > { %830 = vmatmul.mubr.msk.f32.gmra.mrb[6].mxu0 %vm244_vm2, %v223_v9 }
  0x7f   : > { %832 = vmatprep.mubr.msk.f32.mxu0 %vm1160_vm0, %v1161_v1 }
  0x82   : > { %833 = vmatmul.mubr.msk.f32.gmra.mrb[8].mxu0 %vm244_vm2, %v224_v10 }
  0x83   : > { %835 = vmatprep.mubr.msk.f32.mxu0 %vm1160_vm0, %v1161_v1 }
  0x86   : > { %836 = vmatmul.mubr.msk.f32.gmra.mrb[10].mxu0 %vm244_vm2, %v225_v11 }
  0x87   : > { %838 = vmatprep.mubr.msk.f32.mxu0 %vm1160_vm0, %v1161_v1 }
  0x8a   : > { %839 = vmatmul.mubr.msk.f32.gmra.mrb[12].mxu0 %vm244_vm2, %v226_v12 }
  0x8b   : > { %841 = vmatprep.mubr.msk.f32.mxu0 %vm1160_vm0, %v1161_v1 }
  0x8e   : > { %842 = vmatmul.mubr.msk.f32.gmra.mrb[14].mxu0 %vm244_vm2, %v227_v13 }
  0x8f   : > { %844 = vmatprep.mubr.msk.f32.mxu0 %vm1160_vm0, %v1161_v1 }
  0x92   : > { %845 = vmatmul.mubr.msk.f32.gmra.mrb[16].mxu0 %vm244_vm2, %v228_v14 }
  0x93   : > { %847 = vmatprep.mubr.msk.f32.mxu0 %vm1160_vm0, %v1161_v1 }
  0x96   : > { %848 = vmatmul.mubr.msk.f32.gmra.mrb[18].mxu0 %vm244_vm2, %v229_v15 }
  0x97   : > { %850 = vmatprep.mubr.msk.f32.mxu0 %vm1160_vm0, %v1161_v1 }
  0x9a   : > { %851 = vmatmul.mubr.msk.f32.gmra.mrb[20].mxu0 %vm244_vm2, %v230_v16 }
  0x9b   : > { %853 = vmatprep.mubr.msk.f32.mxu0 %vm1160_vm0, %v1161_v1 }
  0x9e   : > { %854 = vmatmul.mubr.msk.f32.gmra.mrb[22].mxu0 %vm244_vm2, %v231_v17 }
  0x9f   : > { %856 = vmatprep.mubr.msk.f32.mxu0 %vm1160_vm0, %v1161_v1 }
  0xa2   : > { %857 = vmatmul.mubr.msk.f32.gmra.mrb[24].mxu0 %vm244_vm2, %v232_v18  ;;  %v482_v18 = vld [vmem:[#allocation5] sm:$0xff] }
  0xa3   : > { %859 = vmatprep.mubr.msk.f32.mxu0 %vm1160_vm0, %v1161_v1 }
  0xa6   : > { %860 = vmatmul.mubr.msk.f32.gmra.mrb[26].mxu0 %vm244_vm2, %v233_v19  ;;  %v485_v19 = vld [vmem:[#allocation5 + $0x18] sm:$0xff] }
  0xa7   : > { %862 = vmatprep.mubr.msk.f32.mxu0 %vm1160_vm0, %v1161_v1 }
  0xaa   : > { %863 = vmatmul.mubr.msk.f32.gmra.mrb[28].mxu0 %vm244_vm2, %v234_v20  ;;  %v484_v20 = vld [vmem:[#allocation5 + $0x10] sm:$0xff] }
  0xab   : > { %865 = vmatprep.mubr.msk.f32.mxu0 %vm1160_vm0, %v1161_v1 }
  0xae   : > { %866 = vmatmul.mubr.msk.f32.gmra.mrb[30].mxu0 %vm244_vm2, %v235_v21  ;;  %v487_v21 = vld [vmem:[#allocation5 + $0x28] sm:$0xff] }
  0xaf   : > { %868 = vmatprep.mubr.msk.f32.mxu0 %vm1160_vm0, %v1161_v1 }
  0xb2   : > { %869 = vmatmul.mubr.msk.f32.gmra.mrb[32].mxu0 %vm244_vm2, %v236_v22  ;;  %v489_v22 = vld [vmem:[#allocation5 + $0x38] sm:$0xff] }
  0xb3   : > { %871 = vmatprep.mubr.msk.f32.mxu0 %vm1160_vm0, %v1161_v1 }
  0xb6   : > { %872 = vmatmul.mubr.msk.f32.gmra.mrb[34].mxu0 %vm244_vm2, %v237_v23  ;;  %v488_v23 = vld [vmem:[#allocation5 + $0x30] sm:$0xff] }
  0xb7   : > { %874 = vmatprep.mubr.msk.f32.mxu0 %vm1160_vm0, %v1161_v1 }
  0xba   : > { %875 = vmatmul.mubr.msk.f32.gmra.mrb[36].mxu0 %vm244_vm2, %v238_v24  ;;  %v491_v24 = vld [vmem:[#allocation5 + $0x48] sm:$0xff] }
  0xbb   : > { %877 = vmatprep.mubr.msk.f32.mxu0 %vm1160_vm0, %v1161_v1 }
  0xbe   : > { %878 = vmatmul.mubr.msk.f32.gmra.mrb[38].mxu0 %vm244_vm2, %v239_v25  ;;  %v493_v25 = vld [vmem:[#allocation5 + $0x58] sm:$0xff] }
  0xbf   : > { %880 = vmatprep.mubr.msk.f32.mxu0 %vm1160_vm0, %v1161_v1 }
  0xc2   : > { %881 = vmatmul.mubr.msk.f32.gmra.mrb[40].mxu0 %vm244_vm2, %v240_v26  ;;  %v492_v26 = vld [vmem:[#allocation5 + $0x50] sm:$0xff] }
 0x145   : > { %v378_v28 = vpop.f32.mrb[0].mxu0 }
 0x146   : > { %v822_v29 = vpop.f32.mrb[1].mxu0 }
 0x147   : > { %v497_v29 = vld [vmem:[#allocation5 + $0x78] sm:$0xff] }
 0x149   : > { %v383_v30 = vpop.f32.mrb[2].mxu0 }
 0x14a   : > { %v887_v31 = vpack.c.bf16 %v383_v30, %v378_v28  ;;  %v825_v32 = vpop.f32.mrb[3].mxu0  ;;  %v494_v28 = vld [vmem:[#allocation5 + $0x60] sm:$0xff]  ;;  %v496_v30 = vld [vmem:[#allocation5 + $0x70] sm:$0xff] }
 0x14c   : > { %888 = vmatpush1.bf16.msra.mxu1 %v887_v31 }
 0x14d   : > { %v388_v33 = vpop.f32.mrb[4].mxu0  ;;  %889 = vmatprep.subr.bf16.mxu1 %v1159_v0 }
 0x14e   : > { %v828_v34 = vpop.f32.mrb[5].mxu0 }
 0x151   : > { %v393_v35 = vpop.f32.mrb[6].mxu0 }
 0x152   : > { %v890_v36 = vpack.c.bf16 %v393_v35, %v388_v33  ;;  %v831_v37 = vpop.f32.mrb[7].mxu0 }
 0x154   : > { %891 = vmatpush1.bf16.msra.mxu1 %v890_v36 }
 0x155   : > { %v398_v38 = vpop.f32.mrb[8].mxu0  ;;  %892 = vmatprep.subr.bf16.mxu1 %v1159_v0 }
 0x156   : > { %v834_v39 = vpop.f32.mrb[9].mxu0 }
 0x159   : > { %v403_v40 = vpop.f32.mrb[10].mxu0 }
 0x15a   : > { %v893_v41 = vpack.c.bf16 %v403_v40, %v398_v38  ;;  %v837_v42 = vpop.f32.mrb[11].mxu0 }
 0x15c   : > { %894 = vmatpush1.bf16.msra.mxu1 %v893_v41 }
 0x15d   : > { %v408_v43 = vpop.f32.mrb[12].mxu0  ;;  %895 = vmatprep.subr.bf16.mxu1 %v1159_v0 }
 0x15e   : > { %v840_v44 = vpop.f32.mrb[13].mxu0 }
 0x161   : > { %v413_v45 = vpop.f32.mrb[14].mxu0 }
 0x162   : > { %v896_v46 = vpack.c.bf16 %v413_v45, %v408_v43  ;;  %v843_v47 = vpop.f32.mrb[15].mxu0 }
 0x164   : > { %897 = vmatpush1.bf16.msra.mxu1 %v896_v46 }
 0x165   : > { %v418_v48 = vpop.f32.mrb[16].mxu0  ;;  %898 = vmatprep.subr.bf16.mxu1 %v1159_v0 }
 0x166   : > { %v846_v49 = vpop.f32.mrb[17].mxu0 }
 0x169   : > { %v423_v50 = vpop.f32.mrb[18].mxu0 }
 0x16a   : > { %v899_v51 = vpack.c.bf16 %v423_v50, %v418_v48  ;;  %v849_v52 = vpop.f32.mrb[19].mxu0 }
 0x16c   : > { %900 = vmatpush1.bf16.msra.mxu1 %v899_v51 }
 0x16d   : > { %v428_v53 = vpop.f32.mrb[20].mxu0  ;;  %901 = vmatprep.subr.bf16.mxu1 %v1159_v0 }
 0x16e   : > { %v852_v54 = vpop.f32.mrb[21].mxu0 }
 0x171   : > { %v433_v55 = vpop.f32.mrb[22].mxu0 }
 0x172   : > { %v902_v56 = vpack.c.bf16 %v433_v55, %v428_v53  ;;  %v855_v57 = vpop.f32.mrb[23].mxu0 }
 0x174   : > { %903 = vmatpush1.bf16.msra.mxu1 %v902_v56 }
 0x175   : > { %v438_v58 = vpop.f32.mrb[24].mxu0  ;;  %904 = vmatprep.subr.bf16.mxu1 %v1159_v0 }
 0x176   : > { %v858_v59 = vpop.f32.mrb[25].mxu0 }
 0x179   : > { %v443_v60 = vpop.f32.mrb[26].mxu0 }
 0x17a   : > { %v905_v61 = vpack.c.bf16 %v443_v60, %v438_v58  ;;  %v861_v62 = vpop.f32.mrb[27].mxu0 }
 0x17c   : > { %906 = vmatpush1.bf16.msra.mxu1 %v905_v61 }
 0x17d   : > { %v448_v63 = vpop.f32.mrb[28].mxu0  ;;  %907 = vmatprep.subr.bf16.mxu1 %v1159_v0 }
 0x17e   : > { %v864_v2 = vpop.f32.mrb[29].mxu0 }
 0x181   : > { %v453_v3 = vpop.f32.mrb[30].mxu0 }
 0x182   : > { %v908_v4 = vpack.c.bf16 %v453_v3, %v448_v63  ;;  %v867_v5 = vpop.f32.mrb[31].mxu0 }
 0x184   : > { %909 = vmatpush1.bf16.msra.mxu1 %v908_v4 }
 0x185   : > { %v458_v6 = vpop.f32.mrb[32].mxu0  ;;  %910 = vmatprep.subr.bf16.mxu1 %v1159_v0 }
 0x186   : > { %v870_v7 = vpop.f32.mrb[33].mxu0 }
 0x189   : > { %v463_v8 = vpop.f32.mrb[34].mxu0 }
 0x18a   : > { %v911_v9 = vpack.c.bf16 %v463_v8, %v458_v6  ;;  %v873_v10 = vpop.f32.mrb[35].mxu0 }
 0x18c   : > { %912 = vmatpush1.bf16.msra.mxu1 %v911_v9 }
 0x18d   : > { %v468_v11 = vpop.f32.mrb[36].mxu0  ;;  %913 = vmatprep.subr.bf16.mxu1 %v1159_v0  ;;  %v486_v0 = vld [vmem:[#allocation5 + $0x20] sm:$0xff] }
 0x18e   : > { %v876_v12 = vpop.f32.mrb[37].mxu0 }
 0x191   : > { %v473_v13 = vpop.f32.mrb[38].mxu0 }
 0x192   : > { %v914_v14 = vpack.c.bf16 %v473_v13, %v468_v11  ;;  %v879_v15 = vpop.f32.mrb[39].mxu0 }
 0x194   : > { %915 = vmatpush1.bf16.msra.mxu1 %v914_v14 }
 0x195   : > { %v478_v16 = vpop.f32.mrb[40].mxu0  ;;  %563 = vmatprep.subr.mxu1 %v1161_v1  ;;  %v490_v1 = vld [vmem:[#allocation5 + $0x40] sm:$0xff] }
 0x196   : > { %v882_v17 = vpop.f32.mrb[41].mxu0 }
 0x198   : > { %564 = vmatpush1.msra.mxu1 %v478_v16 }
 0x199   : > { %588 = vmatmul.mubr.f32.vlgmr.msra.gmra.mrb[0].mxu1 %v482_v18 }
 0x19a   : > { %776 = vmatprep.mubr.msk.f32.mxu1 %vm498_vm3, %v485_v19 }
 0x19d   : > { %593 = vmatmul.mubr.f32.gmra.mrb[2].mxu1 %v484_v20 }
 0x19e   : > { %777 = vmatprep.mubr.msk.f32.mxu1 %vm498_vm3, %v487_v21 }
 0x1a1   : > { %598 = vmatmul.mubr.f32.gmra.mrb[4].mxu1 %v486_v0 }
 0x1a2   : > { %778 = vmatprep.mubr.msk.f32.mxu1 %vm498_vm3, %v489_v22 }
 0x1a5   : > { %603 = vmatmul.mubr.f32.gmra.mrb[6].mxu1 %v488_v23 }
 0x1a6   : > { %779 = vmatprep.mubr.msk.f32.mxu1 %vm498_vm3, %v491_v24 }
 0x1a9   : > { %608 = vmatmul.mubr.f32.gmra.mrb[8].mxu1 %v490_v1 }
 0x1aa   : > { %780 = vmatprep.mubr.msk.f32.mxu1 %vm498_vm3, %v493_v25 }
 0x1ad   : > { %613 = vmatmul.mubr.f32.gmra.mrb[10].mxu1 %v492_v26 }
 0x1ae   : > { %781 = vmatprep.mubr.msk.f32.mxu1 %vm498_vm3, %v495_v27 }
 0x1b1   : > { %618 = vmatmul.mubr.f32.gmra.mrb[12].mxu1 %v494_v28 }
 0x1b2   : > { %782 = vmatprep.mubr.msk.f32.mxu1 %vm498_vm3, %v497_v29 }
 0x1b5   : > { %623 = vmatmul.mubr.f32.gmra.mrb[14].mxu1 %v496_v30 }
 0x26c   : > { %v589_v31 = vpop.f32.mrb[0].mxu1 }
 0x26d   : > { %629 = vst.msk [vmem:[%s217_s20] sm:$0xff] %vm628_vm4, %v589_v31  ;;  %v591_v32 = vpop.f32.mrb[1].mxu1 }
 0x270   : > { %v594_v33 = vpop.f32.mrb[2].mxu1 }
 0x271   : > { %630 = vst.msk [vmem:[%s217_s20 + $0x8] sm:$0xff] %vm628_vm4, %v594_v33  ;;  %v596_v34 = vpop.f32.mrb[3].mxu1 }
 0x274   : > { %v599_v35 = vpop.f32.mrb[4].mxu1 }
 0x275   : > { %631 = vst.msk [vmem:[%s217_s20 + $0x10] sm:$0xff] %vm628_vm4, %v599_v35  ;;  %v601_v36 = vpop.f32.mrb[5].mxu1 }
 0x278   : > { %v604_v37 = vpop.f32.mrb[6].mxu1 }
 0x279   : > { %632 = vst.msk [vmem:[%s217_s20 + $0x18] sm:$0xff] %vm628_vm4, %v604_v37  ;;  %v606_v38 = vpop.f32.mrb[7].mxu1 }
 0x27c   : > { %v609_v39 = vpop.f32.mrb[8].mxu1 }
 0x27d   : > { %633 = vst.msk [vmem:[%s217_s20 + $0x20] sm:$0xff] %vm628_vm4, %v609_v39  ;;  %v611_v40 = vpop.f32.mrb[9].mxu1 }
 0x280   : > { %v614_v41 = vpop.f32.mrb[10].mxu1 }
 0x281   : > { %634 = vst.msk [vmem:[%s217_s20 + $0x28] sm:$0xff] %vm628_vm4, %v614_v41  ;;  %v616_v42 = vpop.f32.mrb[11].mxu1 }
 0x284   : > { %v619_v43 = vpop.f32.mrb[12].mxu1 }
 0x285   : > { %635 = vst.msk [vmem:[%s217_s20 + $0x30] sm:$0xff] %vm628_vm4, %v619_v43  ;;  %v621_v44 = vpop.f32.mrb[13].mxu1 }
 0x288   : > { %v624_v45 = vpop.f32.mrb[14].mxu1 }
 0x289   : > { %636 = vst.msk [vmem:[%s217_s20 + $0x38] sm:$0xff] %vm628_vm4, %v624_v45  ;;  %v626_v46 = vpop.f32.mrb[15].mxu1 }
 0x28a   : > { %1093 = shalt.err (!%p1090_p2)
}
 0x28b   : > { %s1094_s11 = scalar_lea.hbm %s1496_s28, 1024  ;;  %s1098_s5 = scalar_lea.hbm %s1544_s3, 2048 }
 0x28c   : > { %p1095_p13 = scmp.ne.s32.totalorder %s1496_s28, %s1094_s11  ;;  %p1099_p4 = scmp.lt.u32.totalorder %s1496_s28, %s1544_s3 }
 0x28d   : > { %p1100_p7 = scmp.lt.u32.totalorder %s1098_s5, %s1094_s11  ;;  %p1102_p11 = scmp.lt.u32.totalorder %s1094_s11, %s1496_s28 }
 0x28e   : > { %p1096_p6 = pnand %p1095_p13, %p1558_p0 }
 0x28f   : > { %p1101_p8 = por %p1100_p7, %p1099_p4 }
 0x290   : > { %p1097_p10 = pneg %p1096_p6 }
 0x291   : > { %p1103_p1 = por %p1102_p11, %p1101_p8 }
 0x293   : > { %p1104_p3 = pnand %p1103_p1, %p1097_p10 }
 0x295   : > { %1107 = shalt.err (!%p1104_p3)
}
 0x296   : > { %s1163_s18 = smov 128   ;;  %s1164_s20 = smov 8  }
 0x297   : > { %928 = dma.vmem_to_hbm [thread:$0]  (%p1558_p0), %s1490_s29, 1024, %s1496_s28, %s638_s22, %s1163_s18, %s1163_s18, %s1164_s20  }
 0x298 PF: > { %s666_s30 = sand.u32 1, %s1138_s12   ;;  %p1559_p5 = scmp.ne.s32.totalorder %s1549_s19, 0 }
 0x299   : > { %p1560_p9 = scmp.ge.s32.totalorder %s1150_s15, 2  ;;  %s667_s17 = scalar_lea.sflag [#allocation4], %s666_s30 }
 0x29b   : > { %p942_p12 = pnand %p1560_p9, %p1559_p5 }
 0x29d   : > { %1133 = dma.done.wait (!%p942_p12), %s667_s17, 1024  }
 0x29e   : > { %1135 = vsyncadd (!%p942_p12), %s667_s17, 4294966272  ;;  %p17_p2 = scmp.ge.s32.totalorder %s1298_s6, 4   ;;  %s1561_s12 = smov %s1142_s13 }
 0x29f   : > { %s1562_s13 = smov %s1146_s14  ;;  %s1563_s14 = smov %s1307_s9 }
 0x2a0   : > { %s1564_s15 = smov %s1298_s6  ;;  %19 = sbr.rel (!%p17_p2) target bundleno = 6 (0x6), region = 85 }
 0x2a7   :  { %672 = vsyncpa [#allocation3], 1 }
 0x2a8   :  { %674 = vsyncpa [#allocation3 + $0x1], 1 }
 0x2a9   :  { %675 = vsyncpa [#allocation6], 1 }
 0x2aa   :  { %676 = vsyncpa [#allocation4], 1 }
 0x2ab   :  { %678 = vsyncpa [#allocation4 + $0x1], 1 }

</bundles_post_ra>
